<compile_context>
chip_gen: v7x
topology: tpu7x:2x2x1
jax: 0.10.0
libtpu: 0.0.40
codegen_flags: <defaults>
</compile_context>

<pallas_src>
import jax
import jax.numpy as jnp
from jax.experimental import pallas as pl
from jax.experimental.pallas import tpu as pltpu

LN_EPS = 1e-5   # torch.nn.LayerNorm default
LANE = 128
SUBLANE = 8


def _round_up(n, m):
    return ((n + m - 1) // m) * m


def _make_fused_kernel(num_hidden, true_hidden_dims):
    """Build a kernel that runs the whole MLP on one batch tile.

    Ref order: x_ref, (w, b, gamma, beta) * num_hidden, w_last, b_last, out_ref.
    Weights are bf16 (padded); biases/gamma/beta are f32 (padded).
    Padded lanes of every intermediate stay exactly zero because weight
    pad-rows/cols, bias, gamma and beta pad-lanes are zero.
    """

    def kernel(x_ref, *refs):
        out_ref = refs[-1]
        prefs = refs[:-1]

        h = x_ref[...].astype(jnp.float32)          # (TB, Kp), pad lanes == 0
        pi = 0
        for li in range(num_hidden):
            w = prefs[pi][...]                      # bf16 (Kp, Hp)
            b = prefs[pi + 1][...]                  # f32  (1, Hp)
            g = prefs[pi + 2][...]                  # f32  (1, Hp)
            beta = prefs[pi + 3][...]               # f32  (1, Hp)
            pi += 4

            # Linear (bf16 MXU, f32 accumulate) + bias.
            h = jnp.dot(h.astype(jnp.bfloat16), w,
                        preferred_element_type=jnp.float32) + b
            # ReLU (VPU).
            h = jnp.maximum(h, 0.0)
            # Dropout: identity (eval mode).

            # LayerNorm over the TRUE hidden width (pad lanes masked out).
            Ht = true_hidden_dims[li]
            Hp = h.shape[-1]
            inv_n = jnp.float32(1.0 / Ht)
            mean = jnp.sum(h, axis=-1, keepdims=True) * inv_n
            centered = h - mean
            if Hp != Ht:
                lane = jax.lax.broadcasted_iota(jnp.int32, (1, Hp), 1)
                centered = centered * (lane < Ht).astype(jnp.float32)
            var = jnp.sum(centered * centered, axis=-1, keepdims=True) * inv_n
            inv = jax.lax.rsqrt(var + LN_EPS)
            # gamma/beta pad lanes are zero -> pad lanes of h stay zero.
            h = centered * inv * g + beta

        # Final Linear.
        w = prefs[pi][...]
        b = prefs[pi + 1][...]
        y = jnp.dot(h.astype(jnp.bfloat16), w,
                    preferred_element_type=jnp.float32) + b
        out_ref[...] = y.astype(out_ref.dtype)

    return kernel


@jax.jit
def fully_connected_forward(x, params):
    """params: list of dicts (f32). Hidden layers: w, b, gamma, beta; last: w, b.

    w has shape (in_features, out_features) so the kernel computes x @ W
    (equivalent to PyTorch's x @ W.T with W stored (out, in)).
    """
    B, D_in = x.shape
    hidden_dims = [layer["w"].shape[1] for layer in params[:-1]]
    out_dim = params[-1]["w"].shape[1]

    # Batch tiling: 128-row tiles for big batches, sublane-rounded otherwise.
    TB = 128 if B >= 128 else _round_up(B, SUBLANE)
    Bp = _round_up(B, TB)
    Dp = _round_up(D_in, LANE)

    x_p = jnp.pad(x.astype(jnp.float32), ((0, Bp - B), (0, Dp - D_in)))

    flat_inputs = [x_p]
    in_specs = [pl.BlockSpec((TB, Dp), lambda i: (i, 0))]

    # Hidden layers: pad to lane-dense widths, bf16 weights, f32 bias/ln params.
    prev_p = Dp
    for layer in params[:-1]:
        d_in, d_out = layer["w"].shape
        Hp = _round_up(d_out, LANE)
        w_p = jnp.pad(layer["w"].astype(jnp.bfloat16),
                      ((0, prev_p - d_in), (0, Hp - d_out)))
        b_p = jnp.pad(layer["b"].astype(jnp.float32), ((0, 0), (0, Hp - d_out)))
        g_p = jnp.pad(layer["gamma"].astype(jnp.float32), ((0, 0), (0, Hp - d_out)))
        be_p = jnp.pad(layer["beta"].astype(jnp.float32), ((0, 0), (0, Hp - d_out)))
        flat_inputs += [w_p, b_p, g_p, be_p]
        in_specs += [
            pl.BlockSpec((prev_p, Hp), lambda i: (0, 0)),   # grid-invariant -> resident
            pl.BlockSpec((1, Hp), lambda i: (0, 0)),
            pl.BlockSpec((1, Hp), lambda i: (0, 0)),
            pl.BlockSpec((1, Hp), lambda i: (0, 0)),
        ]
        prev_p = Hp

    # Final linear.
    last = params[-1]
    d_in, d_out = last["w"].shape
    Op = _round_up(d_out, LANE)
    w_p = jnp.pad(last["w"].astype(jnp.bfloat16),
                  ((0, prev_p - d_in), (0, Op - d_out)))
    b_p = jnp.pad(last["b"].astype(jnp.float32), ((0, 0), (0, Op - d_out)))
    flat_inputs += [w_p, b_p]
    in_specs += [
        pl.BlockSpec((prev_p, Op), lambda i: (0, 0)),
        pl.BlockSpec((1, Op), lambda i: (0, 0)),
    ]

    kernel = _make_fused_kernel(len(params) - 1, hidden_dims)

    # NOTE: at large hidden dims, re-derive the resident-weight budget against
    # VMEM (64 MiB on v7x) and raise vmem_limit_bytes via pltpu.CompilerParams,
    # or add a K-axis grid with a VMEM accumulator.  Not needed at these sizes.
    out_p = pl.pallas_call(
        kernel,
        out_shape=jax.ShapeDtypeStruct((Bp, Op), jnp.float32),
        grid=(Bp // TB,),
        in_specs=in_specs,
        out_specs=pl.BlockSpec((TB, Op), lambda i: (i, 0)),
        compiler_params=pltpu.CompilerParams(
            dimension_semantics=("parallel",)),
    )(*flat_inputs)

    return out_p[:B, :out_dim]


def init_params(key, input_dim, hidden_dims, output_dim):
    """Deterministic init mimicking PyTorch Linear default (uniform +/- 1/sqrt(fan_in))."""
    params = []
    dims = [input_dim] + list(hidden_dims)
    for d_in, d_out in zip(dims[:-1], dims[1:]):
        key, kw, kb = jax.random.split(key, 3)
        bound = 1.0 / jnp.sqrt(d_in)
        params.append(
            dict(
                w=jax.random.uniform(kw, (d_in, d_out), jnp.float32, -bound, bound),
                b=jax.random.uniform(kb, (1, d_out), jnp.float32, -bound, bound),
                gamma=jnp.ones((1, d_out), jnp.float32),
                beta=jnp.zeros((1, d_out), jnp.float32),
            )
        )
    key, kw, kb = jax.random.split(key, 3)
    d_in = dims[-1]
    bound = 1.0 / jnp.sqrt(d_in)
    params.append(
        dict(
            w=jax.random.uniform(kw, (d_in, output_dim), jnp.float32, -bound, bound),
            b=jax.random.uniform(kb, (1, output_dim), jnp.float32, -bound, bound),
        )
    )
    return params


def reference_forward(x, params):
    """Pure-JAX reference using the same bf16-weight / f32-accumulate matmuls."""
    h = x.astype(jnp.float32)
    for layer in params[:-1]:
        h = jnp.dot(h.astype(jnp.bfloat16), layer["w"].astype(jnp.bfloat16),
                    preferred_element_type=jnp.float32) + layer["b"]
        h = jnp.maximum(h, 0.0)
        mean = jnp.mean(h, axis=-1, keepdims=True)
        var = jnp.mean((h - mean) ** 2, axis=-1, keepdims=True)
        h = (h - mean) * jax.lax.rsqrt(var + LN_EPS) * layer["gamma"] + layer["beta"]
    last = params[-1]
    return jnp.dot(h.astype(jnp.bfloat16), last["w"].astype(jnp.bfloat16),
                   preferred_element_type=jnp.float32) + last["b"]


if __name__ == "__main__":
    batch = 8
    input_dim = 32
    hidden_dims = [64, 32]
    output_dim = 16

    key = jax.random.PRNGKey(0)
    key, kx = jax.random.split(key)
    x = jax.random.normal(kx, (batch, input_dim), jnp.float32)
    params = init_params(key, input_dim, hidden_dims, output_dim)

    out = fully_connected_forward(x, params)
    out = jax.block_until_ready(out)

    ref = reference_forward(x, params)
    assert out.shape == (batch, output_dim)
    assert jnp.allclose(out, ref, atol=2e-2, rtol=2e-2), "mismatch vs reference"

    print("KERNEL_OK")
</pallas_src>

<mosaic_0001>
module attributes {stable_mosaic.version = 11 : i64} {
  func.func @kernel(%arg0: i32, %arg1: memref<8x128xf32, #tpu.memory_space<vmem>>, %arg2: memref<128x128xbf16, #tpu.memory_space<vmem>>, %arg3: memref<1x128xf32, #tpu.memory_space<vmem>>, %arg4: memref<1x128xf32, #tpu.memory_space<vmem>>, %arg5: memref<1x128xf32, #tpu.memory_space<vmem>>, %arg6: memref<128x128xbf16, #tpu.memory_space<vmem>>, %arg7: memref<1x128xf32, #tpu.memory_space<vmem>>, %arg8: memref<1x128xf32, #tpu.memory_space<vmem>>, %arg9: memref<1x128xf32, #tpu.memory_space<vmem>>, %arg10: memref<128x128xbf16, #tpu.memory_space<vmem>>, %arg11: memref<1x128xf32, #tpu.memory_space<vmem>>, %arg12: memref<8x128xf32, #tpu.memory_space<vmem>>) attributes {dimension_semantics = [#tpu.dimension_semantics<parallel>], iteration_bounds = array<i64: 1>, scalar_prefetch = 0 : i64, scratch_operands = 0 : i64, tpu.core_type = #tpu.core_type<tc>, window_params = [{transform_indices = @transform_0, window_bounds = array<i64: 8, 128>}, {pipeline_mode = #tpu.pipeline_mode<synchronous>, transform_indices = @transform_1, window_bounds = array<i64: 128, 128>}, {pipeline_mode = #tpu.pipeline_mode<synchronous>, transform_indices = @transform_2, window_bounds = array<i64: 1, 128>}, {pipeline_mode = #tpu.pipeline_mode<synchronous>, transform_indices = @transform_3, window_bounds = array<i64: 1, 128>}, {pipeline_mode = #tpu.pipeline_mode<synchronous>, transform_indices = @transform_4, window_bounds = array<i64: 1, 128>}, {pipeline_mode = #tpu.pipeline_mode<synchronous>, transform_indices = @transform_5, window_bounds = array<i64: 128, 128>}, {pipeline_mode = #tpu.pipeline_mode<synchronous>, transform_indices = @transform_6, window_bounds = array<i64: 1, 128>}, {pipeline_mode = #tpu.pipeline_mode<synchronous>, transform_indices = @transform_7, window_bounds = array<i64: 1, 128>}, {pipeline_mode = #tpu.pipeline_mode<synchronous>, transform_indices = @transform_8, window_bounds = array<i64: 1, 128>}, {pipeline_mode = #tpu.pipeline_mode<synchronous>, transform_indices = @transform_9, window_bounds = array<i64: 128, 128>}, {pipeline_mode = #tpu.pipeline_mode<synchronous>, transform_indices = @transform_10, window_bounds = array<i64: 1, 128>}, {transform_indices = @transform_11, window_bounds = array<i64: 8, 128>}]} {
    %c0 = arith.constant 0 : index
    %c0_0 = arith.constant 0 : index
    %0 = vector.load %arg1[%c0, %c0_0] : memref<8x128xf32, #tpu.memory_space<vmem>>, vector<8x128xf32>
    %c0_1 = arith.constant 0 : index
    %c0_2 = arith.constant 0 : index
    %1 = vector.load %arg2[%c0_1, %c0_2] : memref<128x128xbf16, #tpu.memory_space<vmem>>, vector<128x128xbf16>
    %c0_3 = arith.constant 0 : index
    %c0_4 = arith.constant 0 : index
    %2 = vector.load %arg3[%c0_3, %c0_4] : memref<1x128xf32, #tpu.memory_space<vmem>>, vector<1x128xf32>
    %c0_5 = arith.constant 0 : index
    %c0_6 = arith.constant 0 : index
    %3 = vector.load %arg4[%c0_5, %c0_6] : memref<1x128xf32, #tpu.memory_space<vmem>>, vector<1x128xf32>
    %c0_7 = arith.constant 0 : index
    %c0_8 = arith.constant 0 : index
    %4 = vector.load %arg5[%c0_7, %c0_8] : memref<1x128xf32, #tpu.memory_space<vmem>>, vector<1x128xf32>
    %5 = arith.truncf %0 : vector<8x128xf32> to vector<8x128xbf16>
    %cst = arith.constant dense<0.000000e+00> : vector<8x128xf32>
    %6 = tpu.matmul %5, %1, %cst {dimension_numbers = #tpu.dot_dimension_numbers<[1], [0], [0], [1], [0, 0, 1, 1], [], []>} : vector<8x128xbf16>, vector<128x128xbf16>, vector<8x128xf32> -> vector<8x128xf32>
    %7 = vector.broadcast %2 : vector<1x128xf32> to vector<8x128xf32>
    %8 = arith.addf %6, %7 : vector<8x128xf32>
    %cst_9 = arith.constant 0.000000e+00 : f32
    %9 = vector.broadcast %cst_9 : f32 to vector<8x128xf32>
    %10 = arith.maximumf %8, %9 : vector<8x128xf32>
    %cst_10 = arith.constant dense<0.000000e+00> : vector<8xf32>
    %11 = vector.multi_reduction <add>, %10, %cst_10 [1] : vector<8x128xf32> to vector<8xf32>
    %12 = vector.shape_cast %11 : vector<8xf32> to vector<8x1xf32>
    %cst_11 = arith.constant 1.562500e-02 : f32
    %13 = vector.broadcast %cst_11 : f32 to vector<8x1xf32>
    %14 = arith.mulf %12, %13 : vector<8x1xf32>
    %15 = vector.broadcast %14 : vector<8x1xf32> to vector<8x128xf32>
    %16 = arith.subf %10, %15 : vector<8x128xf32>
    %17 = tpu.iota {dimensions = array<i32: 1>} : vector<1x128xi32>
    %c64_i32 = arith.constant 64 : i32
    %18 = vector.broadcast %c64_i32 : i32 to vector<1x128xi32>
    %19 = arith.cmpi slt, %17, %18 : vector<1x128xi32>
    %20 = arith.extui %19 : vector<1x128xi1> to vector<1x128xi32>
    %21 = arith.sitofp %20 : vector<1x128xi32> to vector<1x128xf32>
    %22 = vector.broadcast %21 : vector<1x128xf32> to vector<8x128xf32>
    %23 = arith.mulf %16, %22 : vector<8x128xf32>
    %24 = arith.mulf %23, %23 : vector<8x128xf32>
    %cst_12 = arith.constant dense<0.000000e+00> : vector<8xf32>
    %25 = vector.multi_reduction <add>, %24, %cst_12 [1] : vector<8x128xf32> to vector<8xf32>
    %26 = vector.shape_cast %25 : vector<8xf32> to vector<8x1xf32>
    %cst_13 = arith.constant 1.562500e-02 : f32
    %27 = vector.broadcast %cst_13 : f32 to vector<8x1xf32>
    %28 = arith.mulf %26, %27 : vector<8x1xf32>
    %cst_14 = arith.constant 9.99999974E-6 : f32
    %29 = vector.broadcast %cst_14 : f32 to vector<8x1xf32>
    %30 = arith.addf %28, %29 : vector<8x1xf32>
    %31 = math.rsqrt %30 : vector<8x1xf32>
    %32 = vector.broadcast %31 : vector<8x1xf32> to vector<8x128xf32>
    %33 = arith.mulf %23, %32 : vector<8x128xf32>
    %34 = vector.broadcast %3 : vector<1x128xf32> to vector<8x128xf32>
    %35 = arith.mulf %33, %34 : vector<8x128xf32>
    %36 = vector.broadcast %4 : vector<1x128xf32> to vector<8x128xf32>
    %37 = arith.addf %35, %36 : vector<8x128xf32>
    %c0_15 = arith.constant 0 : index
    %c0_16 = arith.constant 0 : index
    %38 = vector.load %arg6[%c0_15, %c0_16] : memref<128x128xbf16, #tpu.memory_space<vmem>>, vector<128x128xbf16>
    %c0_17 = arith.constant 0 : index
    %c0_18 = arith.constant 0 : index
    %39 = vector.load %arg7[%c0_17, %c0_18] : memref<1x128xf32, #tpu.memory_space<vmem>>, vector<1x128xf32>
    %c0_19 = arith.constant 0 : index
    %c0_20 = arith.constant 0 : index
    %40 = vector.load %arg8[%c0_19, %c0_20] : memref<1x128xf32, #tpu.memory_space<vmem>>, vector<1x128xf32>
    %c0_21 = arith.constant 0 : index
    %c0_22 = arith.constant 0 : index
    %41 = vector.load %arg9[%c0_21, %c0_22] : memref<1x128xf32, #tpu.memory_space<vmem>>, vector<1x128xf32>
    %42 = arith.truncf %37 : vector<8x128xf32> to vector<8x128xbf16>
    %cst_23 = arith.constant dense<0.000000e+00> : vector<8x128xf32>
    %43 = tpu.matmul %42, %38, %cst_23 {dimension_numbers = #tpu.dot_dimension_numbers<[1], [0], [0], [1], [0, 0, 1, 1], [], []>} : vector<8x128xbf16>, vector<128x128xbf16>, vector<8x128xf32> -> vector<8x128xf32>
    %44 = vector.broadcast %39 : vector<1x128xf32> to vector<8x128xf32>
    %45 = arith.addf %43, %44 : vector<8x128xf32>
    %cst_24 = arith.constant 0.000000e+00 : f32
    %46 = vector.broadcast %cst_24 : f32 to vector<8x128xf32>
    %47 = arith.maximumf %45, %46 : vector<8x128xf32>
    %cst_25 = arith.constant dense<0.000000e+00> : vector<8xf32>
    %48 = vector.multi_reduction <add>, %47, %cst_25 [1] : vector<8x128xf32> to vector<8xf32>
    %49 = vector.shape_cast %48 : vector<8xf32> to vector<8x1xf32>
    %cst_26 = arith.constant 3.125000e-02 : f32
    %50 = vector.broadcast %cst_26 : f32 to vector<8x1xf32>
    %51 = arith.mulf %49, %50 : vector<8x1xf32>
    %52 = vector.broadcast %51 : vector<8x1xf32> to vector<8x128xf32>
    %53 = arith.subf %47, %52 : vector<8x128xf32>
    %54 = tpu.iota {dimensions = array<i32: 1>} : vector<1x128xi32>
    %c32_i32 = arith.constant 32 : i32
    %55 = vector.broadcast %c32_i32 : i32 to vector<1x128xi32>
    %56 = arith.cmpi slt, %54, %55 : vector<1x128xi32>
    %57 = arith.extui %56 : vector<1x128xi1> to vector<1x128xi32>
    %58 = arith.sitofp %57 : vector<1x128xi32> to vector<1x128xf32>
    %59 = vector.broadcast %58 : vector<1x128xf32> to vector<8x128xf32>
    %60 = arith.mulf %53, %59 : vector<8x128xf32>
    %61 = arith.mulf %60, %60 : vector<8x128xf32>
    %cst_27 = arith.constant dense<0.000000e+00> : vector<8xf32>
    %62 = vector.multi_reduction <add>, %61, %cst_27 [1] : vector<8x128xf32> to vector<8xf32>
    %63 = vector.shape_cast %62 : vector<8xf32> to vector<8x1xf32>
    %cst_28 = arith.constant 3.125000e-02 : f32
    %64 = vector.broadcast %cst_28 : f32 to vector<8x1xf32>
    %65 = arith.mulf %63, %64 : vector<8x1xf32>
    %cst_29 = arith.constant 9.99999974E-6 : f32
    %66 = vector.broadcast %cst_29 : f32 to vector<8x1xf32>
    %67 = arith.addf %65, %66 : vector<8x1xf32>
    %68 = math.rsqrt %67 : vector<8x1xf32>
    %69 = vector.broadcast %68 : vector<8x1xf32> to vector<8x128xf32>
    %70 = arith.mulf %60, %69 : vector<8x128xf32>
    %71 = vector.broadcast %40 : vector<1x128xf32> to vector<8x128xf32>
    %72 = arith.mulf %70, %71 : vector<8x128xf32>
    %73 = vector.broadcast %41 : vector<1x128xf32> to vector<8x128xf32>
    %74 = arith.addf %72, %73 : vector<8x128xf32>
    %c0_30 = arith.constant 0 : index
    %c0_31 = arith.constant 0 : index
    %75 = vector.load %arg10[%c0_30, %c0_31] : memref<128x128xbf16, #tpu.memory_space<vmem>>, vector<128x128xbf16>
    %c0_32 = arith.constant 0 : index
    %c0_33 = arith.constant 0 : index
    %76 = vector.load %arg11[%c0_32, %c0_33] : memref<1x128xf32, #tpu.memory_space<vmem>>, vector<1x128xf32>
    %77 = arith.truncf %74 : vector<8x128xf32> to vector<8x128xbf16>
    %cst_34 = arith.constant dense<0.000000e+00> : vector<8x128xf32>
    %78 = tpu.matmul %77, %75, %cst_34 {dimension_numbers = #tpu.dot_dimension_numbers<[1], [0], [0], [1], [0, 0, 1, 1], [], []>} : vector<8x128xbf16>, vector<128x128xbf16>, vector<8x128xf32> -> vector<8x128xf32>
    %79 = vector.broadcast %76 : vector<1x128xf32> to vector<8x128xf32>
    %80 = arith.addf %78, %79 : vector<8x128xf32>
    %c0_35 = arith.constant 0 : index
    %c0_36 = arith.constant 0 : index
    %81 = vector.load %arg12[%c0_35, %c0_36] : memref<8x128xf32, #tpu.memory_space<vmem>>, vector<8x128xf32>
    tpu.vector_store %arg12[%c0_35, %c0_36], %80 {strides = array<i32>} : memref<8x128xf32, #tpu.memory_space<vmem>>, vector<8x128xf32>,
    return
  }
  func.func @transform_0(%arg0: i32) -> (i32, i32) {
    %c0_i32 = arith.constant 0 : i32
    %c0_i32_0 = arith.constant 0 : i32
    return %arg0, %c0_i32 : i32, i32
  }
  func.func @transform_1(%arg0: i32) -> (i32, i32) {
    %c0_i32 = arith.constant 0 : i32
    %c0_i32_0 = arith.constant 0 : i32
    %c0_i32_1 = arith.constant 0 : i32
    return %c0_i32, %c0_i32_0 : i32, i32
  }
  func.func @transform_2(%arg0: i32) -> (i32, i32) {
    %c0_i32 = arith.constant 0 : i32
    %c0_i32_0 = arith.constant 0 : i32
    %c0_i32_1 = arith.constant 0 : i32
    return %c0_i32, %c0_i32_0 : i32, i32
  }
  func.func @transform_3(%arg0: i32) -> (i32, i32) {
    %c0_i32 = arith.constant 0 : i32
    %c0_i32_0 = arith.constant 0 : i32
    %c0_i32_1 = arith.constant 0 : i32
    return %c0_i32, %c0_i32_0 : i32, i32
  }
  func.func @transform_4(%arg0: i32) -> (i32, i32) {
    %c0_i32 = arith.constant 0 : i32
    %c0_i32_0 = arith.constant 0 : i32
    %c0_i32_1 = arith.constant 0 : i32
    return %c0_i32, %c0_i32_0 : i32, i32
  }
  func.func @transform_5(%arg0: i32) -> (i32, i32) {
    %c0_i32 = arith.constant 0 : i32
    %c0_i32_0 = arith.constant 0 : i32
    %c0_i32_1 = arith.constant 0 : i32
    return %c0_i32, %c0_i32_0 : i32, i32
  }
  func.func @transform_6(%arg0: i32) -> (i32, i32) {
    %c0_i32 = arith.constant 0 : i32
    %c0_i32_0 = arith.constant 0 : i32
    %c0_i32_1 = arith.constant 0 : i32
    return %c0_i32, %c0_i32_0 : i32, i32
  }
  func.func @transform_7(%arg0: i32) -> (i32, i32) {
    %c0_i32 = arith.constant 0 : i32
    %c0_i32_0 = arith.constant 0 : i32
    %c0_i32_1 = arith.constant 0 : i32
    return %c0_i32, %c0_i32_0 : i32, i32
  }
  func.func @transform_8(%arg0: i32) -> (i32, i32) {
    %c0_i32 = arith.constant 0 : i32
    %c0_i32_0 = arith.constant 0 : i32
    %c0_i32_1 = arith.constant 0 : i32
    return %c0_i32, %c0_i32_0 : i32, i32
  }
  func.func @transform_9(%arg0: i32) -> (i32, i32) {
    %c0_i32 = arith.constant 0 : i32
    %c0_i32_0 = arith.constant 0 : i32
    %c0_i32_1 = arith.constant 0 : i32
    return %c0_i32, %c0_i32_0 : i32, i32
  }
  func.func @transform_10(%arg0: i32) -> (i32, i32) {
    %c0_i32 = arith.constant 0 : i32
    %c0_i32_0 = arith.constant 0 : i32
    %c0_i32_1 = arith.constant 0 : i32
    return %c0_i32, %c0_i32_0 : i32, i32
  }
  func.func @transform_11(%arg0: i32) -> (i32, i32) {
    %c0_i32 = arith.constant 0 : i32
    %c0_i32_0 = arith.constant 0 : i32
    return %arg0, %c0_i32 : i32, i32
  }
}

</mosaic_0001>

<bundles_post_ra>
// kernel: fully_connected_forward.1
= control target key start
LH: loop header
LB: loop body
LE: loop exit
PB: predicated region body
PF: predicated region fallthrough
CT: control target
= control target key end

     0   :  { %v633_v1 = vmov 0.0   ;;  %vm634_vm0 = vmmov 0   ;;  %s836_s0 = inlined_call_operand.vmem [shape: f32[8,128], index: 0, kind: input, shape index: {}]   ;;  %s837_s1 = inlined_call_operand.vmem [shape: bf16[128,128], index: 1, kind: input, shape index: {}]   ;;  %s838_s2 = inlined_call_operand.vmem [shape: f32[1,128], index: 2, kind: input, shape index: {}]   ;;  %s839_s3 = inlined_call_operand.vmem [shape: f32[1,128], index: 3, kind: input, shape index: {}]   ;;  %s840_s4 = inlined_call_operand.vmem [shape: f32[1,128], index: 4, kind: input, shape index: {}]   ;;  %s841_s5 = inlined_call_operand.vmem [shape: bf16[128,128], index: 5, kind: input, shape index: {}]   ;;  %s842_s6 = inlined_call_operand.vmem [shape: f32[1,128], index: 6, kind: input, shape index: {}]   ;;  %s843_s7 = inlined_call_operand.vmem [shape: f32[1,128], index: 7, kind: input, shape index: {}]   ;;  %s844_s8 = inlined_call_operand.vmem [shape: f32[1,128], index: 8, kind: input, shape index: {}]   ;;  %s845_s9 = inlined_call_operand.vmem [shape: bf16[128,128], index: 9, kind: input, shape index: {}]   ;;  %s846_s10 = inlined_call_operand.vmem [shape: f32[1,128], index: 10, kind: input, shape index: {}]   ;;  %s847_s11 = inlined_call_operand.hbm [shape: f32[8,128], index: 11, kind: output, shape index: {}]  }
   0x1   :  { %v581_v0 = vld [vmem:[%s837_s1] sm:$0xff]   ;;  %518 = vmatprep.subr.bf16.mxu0 %v633_v1  ;;  %538 = vmatprep.subr.bf16.mxu1 %v633_v1  ;;  %v582_v2 = vld [vmem:[%s837_s1 + $0x8] sm:$0xff]   ;;  %v583_v3 = vld [vmem:[%s837_s1 + $0x10] sm:$0xff]  }
   0x2   :  { %519 = vmatpush3.bf16.msra.mxu0 %v581_v0  ;;  %534 = vmatprep.mubr.msk.bf16.mxu0 %vm634_vm0, %v633_v1  ;;  %v584_v4 = vld [vmem:[%s837_s1 + $0x18] sm:$0xff]   ;;  %v585_v5 = vld [vmem:[%s837_s1 + $0x20] sm:$0xff]   ;;  %v586_v6 = vld [vmem:[%s837_s1 + $0x28] sm:$0xff]  }
   0x3   :  { %520 = vmatprep.subr.bf16.mxu0 %v633_v1  ;;  %554 = vmatprep.mubr.msk.bf16.mxu1 %vm634_vm0, %v633_v1 }
   0x6   :  { %521 = vmatpush3.bf16.msra.mxu0 %v582_v2 }
   0x7   :  { %522 = vmatprep.subr.bf16.mxu0 %v633_v1 }
   0xa   :  { %523 = vmatpush3.bf16.msra.mxu0 %v583_v3 }
   0xb   :  { %524 = vmatprep.subr.bf16.mxu0 %v633_v1 }
   0xe   :  { %525 = vmatpush3.bf16.msra.mxu0 %v584_v4 }
   0xf   :  { %526 = vmatprep.subr.bf16.mxu0 %v633_v1 }
  0x12   :  { %527 = vmatpush3.bf16.msra.mxu0 %v585_v5 }
  0x13   :  { %528 = vmatprep.subr.bf16.mxu0 %v633_v1 }
  0x14   :  { %16 = vsyncpa [#allocation3], 0  ;;  %v587_v7 = vld [vmem:[%s837_s1 + $0x30] sm:$0xff]   ;;  %v588_v8 = vld [vmem:[%s837_s1 + $0x38] sm:$0xff]   ;;  %v160_v20 = vlaneseq  ;;  %s635_s13 = smov [#allocation2]  }
  0x15   :  { %v40_v9 = vld [vmem:[%s836_s0] sm:$0xff]  ;;  %v590_v19 = vld [vmem:[%s841_s5 + $0x8] sm:$0xff]   ;;  %v591_v28 = vld [vmem:[%s841_s5 + $0x10] sm:$0xff]   ;;  %s450_s14 = sshll.u32 %s635_s13, 4  ;;  %s451_s14 = int_to_ptr.vmem [resolvable:$true] %s450_s14 }
  0x16   :  { %529 = vmatpush3.bf16.msra.mxu0 %v586_v6  ;;  %v60_v10 = vpack.c.bf16 %v40_v9, %v40_v9  ;;  %v458_v11 = vld [vmem:[%s838_s2] ss:$0 sm:$0xff]  ;;  %v161_v21 = vand.u32 127, %v160_v20  ;;  %v592_v29 = vld [vmem:[%s841_s5 + $0x18] sm:$0xff]   ;;  %v594_v31 = vld [vmem:[%s841_s5 + $0x28] sm:$0xff]   ;;  %p614_p1 = scmp.lt.s32.totalorder %s451_s14, %s451_s14 }
  0x17   :  { %530 = vmatprep.subr.bf16.mxu0 %v633_v1  ;;  %v589_v18 = vld [vmem:[%s841_s5] sm:$0xff]   ;;  %v595_v32 = vld [vmem:[%s841_s5 + $0x30] sm:$0xff]   ;;  %v596_v33 = vld [vmem:[%s841_s5 + $0x38] sm:$0xff]  }
  0x18   :  { %539 = vmatpush3.bf16.msra.mxu1 %v589_v18  ;;  %vm162_vm1 = vcmp.lt.s32.totalorder %v161_v21, 64  ;;  %v593_v30 = vld [vmem:[%s841_s5 + $0x20] sm:$0xff]   ;;  %v598_v52 = vld [vmem:[%s845_s9 + $0x8] sm:$0xff]   ;;  %vm306_vm2 = vcmp.lt.s32.totalorder %v161_v21, 32  ;;  %v599_v59 = vld [vmem:[%s845_s9 + $0x10] sm:$0xff]  }
  0x19   :  { %540 = vmatprep.subr.bf16.mxu1 %v633_v1  ;;  %v467_v24 = vsel %vm162_vm1, 1.0, %v633_v1  ;;  %v468_v38 = vld [vmem:[%s839_s3] ss:$0 sm:$0xff]  ;;  %v479_v55 = vsel %vm306_vm2, 1.0, %v633_v1  ;;  %v600_v60 = vld [vmem:[%s845_s9 + $0x18] sm:$0xff]   ;;  %v602_v62 = vld [vmem:[%s845_s9 + $0x28] sm:$0xff]  }
  0x1a   :  { %531 = vmatpush3.bf16.msra.mxu0 %v587_v7  ;;  %v469_v40 = vld [vmem:[%s840_s4] ss:$0 sm:$0xff]  ;;  %v603_v63 = vld [vmem:[%s845_s9 + $0x30] sm:$0xff]   ;;  %v604_v0 = vld [vmem:[%s845_s9 + $0x38] sm:$0xff]  }
  0x1b   :  { %532 = vmatprep.subr.bf16.mxu0 %v633_v1  ;;  %v470_v44 = vld [vmem:[%s842_s6] ss:$0 sm:$0xff] }
  0x1c   :  { %541 = vmatpush3.bf16.msra.mxu1 %v590_v19  ;;  %v597_v51 = vld [vmem:[%s845_s9] sm:$0xff]  }
  0x1d   :  { %542 = vmatprep.subr.bf16.mxu1 %v633_v1  ;;  %v601_v61 = vld [vmem:[%s845_s9 + $0x20] sm:$0xff]  }
  0x1e   :  { %533 = vmatpush3.bf16.msra.mxu0 %v588_v8  ;;  %v480_v6 = vld [vmem:[%s843_s7] ss:$0 sm:$0xff]  ;;  %s609_s7 = scalar_lea.vmem %s451_s14, 128 }
  0x1f   :  { %558 = vmatprep.subr.bf16.mxu0 %v633_v1  ;;  %v481_v8 = vld [vmem:[%s844_s8] ss:$0 sm:$0xff]  ;;  %p610_p0 = scmp.ne.s32.totalorder %s451_s14, %s609_s7  ;;  %p615_p2 = scmp.lt.s32.totalorder %s609_s7, %s609_s7 }
  0x20   :  { %543 = vmatpush3.bf16.msra.mxu1 %v591_v28 }
  0x21   :  { %535 = vmatmul.mubr.bf16.vlgmr.msra.gmra.mrb[0].mxu0 %v60_v10  ;;  %544 = vmatprep.subr.bf16.mxu1 %v633_v1  ;;  %p616_p3 = por %p615_p2, %p614_p1 }
  0x22   :  { %574 = vmatprep.mubr.msk.bf16.mxu0 %vm634_vm0, %v633_v1  ;;  %559 = vmatpush3.bf16.msra.mxu0 %v597_v51 }
  0x23   :  { %560 = vmatprep.subr.bf16.mxu0 %v633_v1  ;;  %p617_p4 = pnand %p616_p3, %p610_p0 }
  0x24   :  { %545 = vmatpush3.bf16.msra.mxu1 %v592_v29 }
  0x25   :  { %546 = vmatprep.subr.bf16.mxu1 %v633_v1 }
  0x26   :  { %561 = vmatpush3.bf16.msra.mxu0 %v598_v52 }
  0x27   :  { %562 = vmatprep.subr.bf16.mxu0 %v633_v1 }
  0x28   :  { %547 = vmatpush3.bf16.msra.mxu1 %v593_v30 }
  0x29   :  { %548 = vmatprep.subr.bf16.mxu1 %v633_v1 }
  0x2a   :  { %563 = vmatpush3.bf16.msra.mxu0 %v599_v59 }
  0x2b   :  { %564 = vmatprep.subr.bf16.mxu0 %v633_v1 }
  0x2c   :  { %549 = vmatpush3.bf16.msra.mxu1 %v594_v31 }
  0x2d   :  { %550 = vmatprep.subr.bf16.mxu1 %v633_v1 }
  0x2e   :  { %565 = vmatpush3.bf16.msra.mxu0 %v600_v60 }
  0x2f   :  { %566 = vmatprep.subr.bf16.mxu0 %v633_v1 }
  0x30   :  { %551 = vmatpush3.bf16.msra.mxu1 %v595_v32 }
  0x31   :  { %552 = vmatprep.subr.bf16.mxu1 %v633_v1 }
  0x32   :  { %567 = vmatpush3.bf16.msra.mxu0 %v601_v61 }
  0x33   :  { %568 = vmatprep.subr.bf16.mxu0 %v633_v1 }
  0x34   :  { %553 = vmatpush3.bf16.msra.mxu1 %v596_v33 }
  0x36   :  { %569 = vmatpush3.bf16.msra.mxu0 %v602_v62 }
  0x37   :  { %570 = vmatprep.subr.bf16.mxu0 %v633_v1 }
  0x3a   :  { %571 = vmatpush3.bf16.msra.mxu0 %v603_v63 }
  0x3b   :  { %572 = vmatprep.subr.bf16.mxu0 %v633_v1  ;;  %v482_v1 = vld [vmem:[%s846_s10] ss:$0 sm:$0xff] }
  0x3e   :  { %573 = vmatpush3.bf16.msra.mxu0 %v604_v0 }
  0xf4   :  { %v149_v12 = vpop.f32.mrb[0].mxu0 }
  0xf5   :  { %v150_v13 = vadd.f32 %v458_v11, %v149_v12  ;;  %v536_v14 = vpop.f32.mrb[1].mxu0 }
  0xf6   :  { %v152_v15 = vpop.f32.mrb[2].mxu0 }
  0xf7   :  { %v155_v16 = vmax.f32 %v150_v13, 0.0  ;;  %v537_v17 = vpop.f32.mrb[3].mxu0 }
  0xf9   :  { %156 = vadd.xlane.f32.xlu0 %v155_v16 }
 0x186   :  { %v157_v22 = vpop.xlane.xlu0 %156 }
 0x187   :  { %v158_v23 = vmul.f32 0.015625, %v157_v22 }
 0x189   :  { %v159_v25 = vsub.f32 %v155_v16, %v158_v23 }
 0x18b   :  { %v165_v26 = vmul.f32 %v467_v24, %v159_v25 }
 0x18d   :  { %v166_v27 = vmul.f32 %v165_v26, %v165_v26 }
 0x18f   :  { %167 = vadd.xlane.f32.xlu0 %v166_v27 }
 0x21c   :  { %v168_v34 = vpop.xlane.xlu0 %167 }
 0x21d   :  { %v169_v35 = vmul.f32 0.015625, %v168_v34 }
 0x21f   :  { %v170_v36 = vadd.f32 1e-05, %v169_v35 }
 0x221   :  { %605 = vrsqrt.f32 %v170_v36 }
 0x22b   :  { %v606_v37 = vpop.eup %605 }
 0x22c   :  { %v172_v39 = vmul.f32 %v606_v37, %v165_v26 }
 0x22e   :  { %v179_v41 = vmul.f32 %v468_v38, %v172_v39 }
 0x230   :  { %v186_v42 = vadd.f32 %v469_v40, %v179_v41 }
 0x232   :  { %v206_v43 = vpack.c.bf16 %v186_v42, %v186_v42 }
 0x234   :  { %555 = vmatmul.mubr.bf16.vlgmr.msra.gmra.mrb[0].mxu1 %v206_v43 }
 0x307   :  { %v295_v45 = vpop.f32.mrb[0].mxu1 }
 0x308   :  { %v296_v46 = vadd.f32 %v470_v44, %v295_v45  ;;  %v556_v47 = vpop.f32.mrb[1].mxu1 }
 0x309   :  { %v298_v48 = vpop.f32.mrb[2].mxu1 }
 0x30a   :  { %v301_v49 = vmax.f32 %v296_v46, 0.0  ;;  %v557_v50 = vpop.f32.mrb[3].mxu1 }
 0x30c   :  { %302 = vadd.xlane.f32.xlu1 %v301_v49 }
 0x399   :  { %v303_v53 = vpop.xlane.xlu1 %302 }
 0x39a   :  { %v304_v54 = vmul.f32 0.03125, %v303_v53 }
 0x39c   :  { %v305_v56 = vsub.f32 %v301_v49, %v304_v54 }
 0x39e   :  { %v309_v57 = vmul.f32 %v479_v55, %v305_v56 }
 0x3a0   :  { %v310_v58 = vmul.f32 %v309_v57, %v309_v57 }
 0x3a2   :  { %311 = vadd.xlane.f32.xlu1 %v310_v58 }
 0x42f   :  { %v312_v2 = vpop.xlane.xlu1 %311 }
 0x430   :  { %v313_v3 = vmul.f32 0.03125, %v312_v2 }
 0x432   :  { %v314_v4 = vadd.f32 1e-05, %v313_v3 }
 0x434   :  { %607 = vrsqrt.f32 %v314_v4 }
 0x43e   :  { %v608_v5 = vpop.eup %607 }
 0x43f   :  { %v316_v7 = vmul.f32 %v608_v5, %v309_v57 }
 0x441   :  { %v323_v9 = vmul.f32 %v480_v6, %v316_v7 }
 0x443   :  { %v330_v10 = vadd.f32 %v481_v8, %v323_v9 }
 0x445   :  { %v348_v11 = vpack.c.bf16 %v330_v10, %v330_v10 }
 0x447   :  { %575 = vmatmul.mubr.bf16.vlgmr.msra.gmra.mrb[4].mxu0 %v348_v11 }
 0x51a   :  { %v437_v12 = vpop.f32.mrb[4].mxu0 }
 0x51b   :  { %v438_v13 = vadd.f32 %v482_v1, %v437_v12  ;;  %v576_v14 = vpop.f32.mrb[5].mxu0 }
 0x51c   :  { %v440_v15 = vpop.f32.mrb[6].mxu0 }
 0x51d   :  { %443 = vst [vmem:[#allocation2] sm:$0xff] %v438_v13  ;;  %v577_v16 = vpop.f32.mrb[7].mxu0 }
 0x51e   :  { %620 = shalt.err (!%p617_p4)
}
 0x51f   :  { %s621_s10 = scalar_lea.hbm %s847_s11, 128 }
 0x520   :  { %p622_p5 = scmp.ne.s32.totalorder %s847_s11, %s621_s10  ;;  %p625_p6 = scmp.lt.u32.totalorder %s621_s10, %s847_s11 }
 0x522   :  { %p627_p7 = pnand %p625_p6, %p622_p5 }
 0x524   :  { %630 = shalt.err (!%p627_p7)
}
 0x525   :  { %453 = dma.vmem_to_hbm [thread:$0]  %s451_s14, 128, %s847_s11, [#allocation3]  }
 0x526   :  { %631 = dma.done.wait [#allocation3], 128  }
 0x527   :  { %632 = vsyncadd [#allocation3], 4294967168 }
 0x528   :  { %457 = vsyncpa [#allocation3], 1 }

</bundles_post_ra>
